<compile_context>
chip_gen: v7x
topology: tpu7x:2x2x1
jax: 0.10.0
libtpu: 0.0.40
codegen_flags: <defaults>
</compile_context>

<pallas_src>
import jax
import jax.numpy as jnp
from jax.experimental import pallas as pl
from jax.experimental.pallas import tpu as pltpu
from functools import partial


def _round_up(x, m):
    return (x + m - 1) // m * m


def _conv_relu_sample_kernel(sigma_ref, p_ref, w_ref, b_ref, eps_ref, o_ref):
    """One row-tile of: im2col-matmul conv + bias + ReLU + sigma * eps.

    sigma_ref : (1, 1)   f32  SMEM   scalar std
    p_ref     : (TM, Kp) bf16 VMEM   im2col patches (zero-padded K)
    w_ref     : (Kp, Cp) bf16 VMEM   flattened conv weights (zero-padded)
    b_ref     : (1,  Cp) f32  VMEM   bias (zero-padded)
    eps_ref   : (TM, Cp) f32  VMEM   standard-normal noise tile
    o_ref     : (TM, Cp) f32  VMEM   output (lane-dense, Cp = 128)
    """
    # Single fused matmul on the MXU, f32 accumulation.
    acc = jnp.dot(p_ref[...], w_ref[...], preferred_element_type=jnp.float32)
    acc = jnp.maximum(acc + b_ref[...], 0.0)              # bias + ReLU (f32 epilogue)
    # Reparameterized Normal sample: mean + sigma * eps.
    o_ref[...] = acc + sigma_ref[0, 0] * eps_ref[...]


@partial(jax.jit, static_argnames=("padding", "tile_m"))
def image_reconstruction(x_nchw, weight_oihw, bias, sigma, key, padding=2, tile_m=128):
    """NCHW in / NCHW out: ReLU(Conv2d(x, W, b, padding)) + sigma * N(0,1) sample."""
    B, Cin, H, W = x_nchw.shape
    Cout, _, KH, KW = weight_oihw.shape
    Ho = H + 2 * padding - KH + 1
    Wo = W + 2 * padding - KW + 1
    N = B * Ho * Wo
    K = KH * KW * Cin
    Kp = _round_up(K, 128)          # contraction dim, lane-dense
    Cp = _round_up(Cout, 128)       # output channel dim, lane-dense
    Np = _round_up(N, tile_m)       # row dim, multiple of the tile

    # ---- wrapper-side layout plumbing: pad + im2col done ONCE ------------------
    x_nhwc = jnp.transpose(x_nchw, (0, 2, 3, 1)).astype(jnp.float32)
    x_pad = jnp.pad(x_nhwc, ((0, 0), (padding, padding), (padding, padding), (0, 0)))
    taps = [x_pad[:, kh:kh + Ho, kw:kw + Wo, :]
            for kh in range(KH) for kw in range(KW)]
    patches = jnp.concatenate(taps, axis=-1).reshape(N, K)        # (N, KH*KW*Cin)
    patches = jnp.pad(patches, ((0, Np - N), (0, Kp - K))).astype(jnp.bfloat16)

    # Weights reordered to match (kh, kw, cin) patch feature order, then padded.
    w = jnp.transpose(weight_oihw, (2, 3, 1, 0)).reshape(K, Cout)
    w = jnp.pad(w, ((0, Kp - K), (0, Cp - Cout))).astype(jnp.bfloat16)
    b2d = jnp.pad(bias.reshape(1, Cout).astype(jnp.float32), ((0, 0), (0, Cp - Cout)))

    # Standard-normal noise for the reparameterized sample (portable everywhere).
    eps = jax.random.normal(key, (Np, Cp), dtype=jnp.float32)

    sigma_arr = jnp.asarray(sigma, jnp.float32).reshape((1, 1))

    grid = (Np // tile_m,)
    out = pl.pallas_call(
        _conv_relu_sample_kernel,
        out_shape=jax.ShapeDtypeStruct((Np, Cp), jnp.float32),
        grid=grid,
        in_specs=[
            pl.BlockSpec(memory_space=pltpu.MemorySpace.SMEM),        # sigma scalar
            pl.BlockSpec((tile_m, Kp), lambda i: (i, 0)),             # patches tile
            pl.BlockSpec((Kp, Cp), lambda i: (0, 0)),                 # weights
            pl.BlockSpec((1, Cp), lambda i: (0, 0)),                  # bias
            pl.BlockSpec((tile_m, Cp), lambda i: (i, 0)),             # eps tile
        ],
        out_specs=pl.BlockSpec((tile_m, Cp), lambda i: (i, 0)),
        compiler_params=pltpu.CompilerParams(
            dimension_semantics=("parallel",)),
        cost_estimate=pl.CostEstimate(
            flops=2 * Np * Kp * Cp,
            transcendentals=0,
            bytes_accessed=(Np * Kp * 2 + Kp * Cp * 2 + Cp * 4
                            + Np * Cp * 4 + Np * Cp * 4)),
    )(sigma_arr, patches, w, b2d, eps)

    out = out[:N, :Cout].reshape(B, Ho, Wo, Cout)
    return jnp.transpose(out, (0, 3, 1, 2))     # back to NCHW


if __name__ == "__main__":
    # Shapes consistent with the module: Conv2d(in=4, out=4, k=5, padding=2).
    B, Cin, H, W = 2, 4, 16, 16
    Cout, K = 4, 5
    sigma = 0.3
    padding = 2

    key = jax.random.PRNGKey(0)
    k_x, k_w, k_b, k_eps = jax.random.split(key, 4)
    x = jax.random.normal(k_x, (B, Cin, H, W), dtype=jnp.float32)
    bound = 1.0 / (Cin * K * K) ** 0.5
    weight = jax.random.uniform(k_w, (Cout, Cin, K, K), minval=-bound, maxval=bound,
                                dtype=jnp.float32)
    bias = jax.random.uniform(k_b, (Cout,), minval=-bound, maxval=bound,
                              dtype=jnp.float32)

    # Pure-JAX reference for the deterministic part (conv + bias + ReLU).
    conv_ref = jax.lax.conv_general_dilated(
        x, weight, window_strides=(1, 1),
        padding=((padding, padding), (padding, padding)),
        dimension_numbers=("NCHW", "OIHW", "NCHW"))
    mean_ref = jnp.maximum(conv_ref + bias[None, :, None, None], 0.0)

    # 1) sigma = 0: the Normal sample collapses to the mean -> direct check
    #    (bf16 matmul inputs -> loosened tolerance).
    out0 = jax.block_until_ready(image_reconstruction(x, weight, bias, 0.0, k_eps))
    assert out0.shape == (B, Cout, H, W)
    assert jnp.allclose(out0, mean_ref, atol=5e-2, rtol=5e-2), "conv+ReLU mismatch"

    # 2) sigma > 0: reparameterized sample; validate the injected noise statistics.
    out = jax.block_until_ready(image_reconstruction(x, weight, bias, sigma, k_eps))
    assert out.shape == (B, Cout, H, W)
    resid = out - mean_ref
    m = float(jnp.mean(resid))
    s = float(jnp.std(resid))
    assert abs(m) < 0.1, f"noise mean off: {m}"
    assert 0.15 < s < 0.45, f"noise std off: {s}"

    print("KERNEL_OK")
</pallas_src>

<mosaic_0001>
module attributes {stable_mosaic.version = 11 : i64} {
  func.func @_conv_relu_sample_kernel(%arg0: i32, %arg1: memref<1x1xf32, #tpu.memory_space<smem>>, %arg2: memref<128x128xbf16, #tpu.memory_space<vmem>>, %arg3: memref<128x128xbf16, #tpu.memory_space<vmem>>, %arg4: memref<1x128xf32, #tpu.memory_space<vmem>>, %arg5: memref<128x128xf32, #tpu.memory_space<vmem>>, %arg6: memref<128x128xf32, #tpu.memory_space<vmem>>) attributes {dimension_semantics = [#tpu.dimension_semantics<parallel>], iteration_bounds = array<i64: 4>, scalar_prefetch = 0 : i64, scratch_operands = 0 : i64, tpu.core_type = #tpu.core_type<tc>, window_params = [{transform_indices = @transform_0, window_bounds = array<i64: 1, 1>}, {transform_indices = @transform_1, window_bounds = array<i64: 128, 128>}, {pipeline_mode = #tpu.pipeline_mode<synchronous>, transform_indices = @transform_2, window_bounds = array<i64: 128, 128>}, {pipeline_mode = #tpu.pipeline_mode<synchronous>, transform_indices = @transform_3, window_bounds = array<i64: 1, 128>}, {transform_indices = @transform_4, window_bounds = array<i64: 128, 128>}, {transform_indices = @transform_5, window_bounds = array<i64: 128, 128>}]} {
    %c0 = arith.constant 0 : index
    %c0_0 = arith.constant 0 : index
    %0 = vector.load %arg2[%c0, %c0_0] : memref<128x128xbf16, #tpu.memory_space<vmem>>, vector<128x128xbf16>
    %c0_1 = arith.constant 0 : index
    %c0_2 = arith.constant 0 : index
    %1 = vector.load %arg3[%c0_1, %c0_2] : memref<128x128xbf16, #tpu.memory_space<vmem>>, vector<128x128xbf16>
    %cst = arith.constant dense<0.000000e+00> : vector<128x128xf32>
    %2 = tpu.matmul %0, %1, %cst {dimension_numbers = #tpu.dot_dimension_numbers<[1], [0], [0], [1], [0, 0, 1, 1], [], []>} : vector<128x128xbf16>, vector<128x128xbf16>, vector<128x128xf32> -> vector<128x128xf32>
    %c0_3 = arith.constant 0 : index
    %c0_4 = arith.constant 0 : index
    %3 = vector.load %arg4[%c0_3, %c0_4] : memref<1x128xf32, #tpu.memory_space<vmem>>, vector<1x128xf32>
    %4 = vector.broadcast %3 : vector<1x128xf32> to vector<128x128xf32>
    %5 = arith.addf %2, %4 : vector<128x128xf32>
    %cst_5 = arith.constant 0.000000e+00 : f32
    %6 = vector.broadcast %cst_5 : f32 to vector<128x128xf32>
    %7 = arith.maximumf %5, %6 : vector<128x128xf32>
    %c0_6 = arith.constant 0 : index
    %c0_7 = arith.constant 0 : index
    %8 = memref.load %arg1[%c0_6, %c0_7] : memref<1x1xf32, #tpu.memory_space<smem>>
    %c0_8 = arith.constant 0 : index
    %c0_9 = arith.constant 0 : index
    %9 = vector.load %arg5[%c0_8, %c0_9] : memref<128x128xf32, #tpu.memory_space<vmem>>, vector<128x128xf32>
    %10 = vector.broadcast %8 : f32 to vector<128x128xf32>
    %11 = arith.mulf %10, %9 : vector<128x128xf32>
    %12 = arith.addf %7, %11 : vector<128x128xf32>
    %c0_10 = arith.constant 0 : index
    %c0_11 = arith.constant 0 : index
    %13 = vector.load %arg6[%c0_10, %c0_11] : memref<128x128xf32, #tpu.memory_space<vmem>>, vector<128x128xf32>
    tpu.vector_store %arg6[%c0_10, %c0_11], %12 {strides = array<i32>} : memref<128x128xf32, #tpu.memory_space<vmem>>, vector<128x128xf32>,
    return
  }
  func.func @transform_0(%arg0: i32) -> (i32, i32) {
    %c0_i32 = arith.constant 0 : i32
    %c0_i32_0 = arith.constant 0 : i32
    %c0_i32_1 = arith.constant 0 : i32
    return %c0_i32, %c0_i32_0 : i32, i32
  }
  func.func @transform_1(%arg0: i32) -> (i32, i32) {
    %c0_i32 = arith.constant 0 : i32
    %c0_i32_0 = arith.constant 0 : i32
    return %arg0, %c0_i32 : i32, i32
  }
  func.func @transform_2(%arg0: i32) -> (i32, i32) {
    %c0_i32 = arith.constant 0 : i32
    %c0_i32_0 = arith.constant 0 : i32
    %c0_i32_1 = arith.constant 0 : i32
    return %c0_i32, %c0_i32_0 : i32, i32
  }
  func.func @transform_3(%arg0: i32) -> (i32, i32) {
    %c0_i32 = arith.constant 0 : i32
    %c0_i32_0 = arith.constant 0 : i32
    %c0_i32_1 = arith.constant 0 : i32
    return %c0_i32, %c0_i32_0 : i32, i32
  }
  func.func @transform_4(%arg0: i32) -> (i32, i32) {
    %c0_i32 = arith.constant 0 : i32
    %c0_i32_0 = arith.constant 0 : i32
    return %arg0, %c0_i32 : i32, i32
  }
  func.func @transform_5(%arg0: i32) -> (i32, i32) {
    %c0_i32 = arith.constant 0 : i32
    %c0_i32_0 = arith.constant 0 : i32
    return %arg0, %c0_i32 : i32, i32
  }
}

</mosaic_0001>

<bundles_post_ra>
// kernel: image_reconstruction.1
= control target key start
LH: loop header
LB: loop body
LE: loop exit
PB: predicated region body
PF: predicated region fallthrough
CT: control target
= control target key end

     0   :  { %s793_s20 = smov 0   ;;  %s930_s0 = inlined_call_operand.<no memory space> [shape: f32[1,1], index: 0, kind: input, shape index: {}]   ;;  %s931_s1 = inlined_call_operand.vmem [shape: bf16[512,128], index: 1, kind: input, shape index: {}]   ;;  %s932_s2 = inlined_call_operand.vmem [shape: bf16[128,128], index: 2, kind: input, shape index: {}]   ;;  %s933_s3 = inlined_call_operand.vmem [shape: f32[1,128], index: 3, kind: input, shape index: {}]   ;;  %s934_s4 = inlined_call_operand.vmem [shape: f32[512,128], index: 4, kind: input, shape index: {}]   ;;  %s935_s5 = inlined_call_operand.vmem [shape: f32[512,128], index: 5, kind: output, shape index: {}]  }
   0x1   :  { %10 = sst [smem:[#allocation2]] %s930_s0 }
   0x2 LB: > { %s634_s21 = sadd.s32 4294967295, %s758_s20   ;;  %p638_p0 = scmp.ge.s32.totalorder %s758_s20, 1  ;;  %s758_s20 = sphi %s793_s20, %s16_s20  }
   0x3   : > { %p200_p1 = scmp.lt.s32.totalorder %s758_s20, 5 }
   0x5   : > { %p201_p2 = pnand %p638_p0, %p200_p1 }
   0x6   : > { %v736_v0 = vld [vmem:[%s932_s2] sm:$0xff] (!%p201_p2)   ;;  %s639_s0 = sshll.u32 (!%p201_p2), %s634_s21, 4  ;;  %v737_v1 = vld [vmem:[%s932_s2 + $0x8] sm:$0xff] (!%p201_p2)   ;;  %v738_v2 = vld [vmem:[%s932_s2 + $0x10] sm:$0xff] (!%p201_p2)   ;;  %s500_s17 = sld [smem:[#allocation2]] (!%p201_p2) }
   0x7   : > { %204 = sbr.rel (%p201_p2) target bundleno = 269 (0x10d), region = 40  ;;  %p234_p3 = scmp.lt.s32.totalorder (!%p201_p2), %s639_s0, 63  ;;  %680 = vmatprep.subr.bf16.mxu0 (!%p201_p2), %v736_v0  ;;  %712 = vmatprep.subr.bf16.mxu1 (!%p201_p2), %v736_v0  ;;  %v739_v3 = vld [vmem:[%s932_s2 + $0x18] sm:$0xff] (!%p201_p2)   ;;  %v740_v6 = vld [vmem:[%s932_s2 + $0x20] sm:$0xff] (!%p201_p2)   ;;  %v741_v7 = vld [vmem:[%s932_s2 + $0x28] sm:$0xff] (!%p201_p2)  }
   0x8   : > { %681 = vmatpush3.bf16.msra.mxu0 (!%p201_p2), %v736_v0  ;;  %720 = vmatpush3.bf16.msra.mxu1 (!%p201_p2), %v736_v0  ;;  %v742_v8 = vld [vmem:[%s932_s2 + $0x30] sm:$0xff] (!%p201_p2)   ;;  %v743_v9 = vld [vmem:[%s932_s2 + $0x38] sm:$0xff] (!%p201_p2)   ;;  %v858_v21 = vld [vmem:[%s933_s3] ss:$0 sm:$0xff] (!%p201_p2) }
   0x9   : > { %682 = vmatprep.subr.bf16.mxu0 (!%p201_p2), %v737_v1  ;;  %713 = vmatprep.subr.bf16.mxu1 (!%p201_p2), %v737_v1 }
   0xc   : > { %683 = vmatpush3.bf16.msra.mxu0 (!%p201_p2), %v737_v1  ;;  %721 = vmatpush3.bf16.msra.mxu1 (!%p201_p2), %v737_v1  ;;  %v850_v17 = vstv (!%p201_p2), %s500_s17 }
   0xd   : > { %684 = vmatprep.subr.bf16.mxu0 (!%p201_p2), %v738_v2  ;;  %714 = vmatprep.subr.bf16.mxu1 (!%p201_p2), %v738_v2 }
   0xe   : > { %s937_s0 = smov (!%p234_p3, %s639_s0), 63 }
   0xf   : > { %s640_s28 = sshll.u32 %s937_s0, 2  ;;  %s642_s18 = sshll.u32 %s937_s0, 3 }
  0x10   : > { %s816_s6 = scalar_lea.vmem %s931_s1, %s640_s28  ;;  %685 = vmatpush3.bf16.msra.mxu0 %v738_v2  ;;  %722 = vmatpush3.bf16.msra.mxu1 %v738_v2  ;;  %s847_s22 = scalar_lea.vmem %s934_s4, %s642_s18 }
  0x11   : > { %v744_v4 = vld [vmem:[%s816_s6] sm:$0xff]   ;;  %686 = vmatprep.subr.bf16.mxu0 %v739_v3  ;;  %715 = vmatprep.subr.bf16.mxu1 %v739_v3  ;;  %v746_v10 = vld [vmem:[%s816_s6 + $0x8] sm:$0xff]   ;;  %v748_v12 = vld [vmem:[%s816_s6 + $0x10] sm:$0xff]   ;;  %s883_s27 = scalar_lea.vmem %s935_s5, %s642_s18 }
  0x12   : > { %v745_v5 = vld [vmem:[%s816_s6 + $0x20] sm:$0xff]   ;;  %696 = vmatprep.mubr.bf16.mxu0 %v744_v4  ;;  %v747_v11 = vld [vmem:[%s816_s6 + $0x28] sm:$0xff]   ;;  %v749_v13 = vld [vmem:[%s816_s6 + $0x30] sm:$0xff]  }
  0x13   : > { %704 = vmatprep.mubr.bf16.mxu1 %v745_v5  ;;  %v750_v14 = vld [vmem:[%s816_s6 + $0x18] sm:$0xff]   ;;  %v503_v16 = vld [vmem:[%s847_s22 + $0x10] sm:$0xff]  ;;  %v501_v19 = vld [vmem:[%s847_s22] sm:$0xff] }
  0x14   : > { %687 = vmatpush3.bf16.msra.mxu0 %v739_v3  ;;  %723 = vmatpush3.bf16.msra.mxu1 %v739_v3  ;;  %v751_v15 = vld [vmem:[%s816_s6 + $0x38] sm:$0xff]   ;;  %v511_v18 = vld [vmem:[%s847_s22 + $0x50] sm:$0xff]  ;;  %v509_v20 = vld [vmem:[%s847_s22 + $0x40] sm:$0xff]  ;;  %v520_v27 = vmul.f32 %v850_v17, %v503_v16  ;;  %v518_v30 = vmul.f32 %v850_v17, %v501_v19 }
  0x15   : > { %688 = vmatprep.subr.bf16.mxu0 %v740_v6  ;;  %716 = vmatprep.subr.bf16.mxu1 %v740_v6  ;;  %v504_v22 = vld [vmem:[%s847_s22 + $0x18] sm:$0xff]  ;;  %v502_v24 = vld [vmem:[%s847_s22 + $0x8] sm:$0xff]  ;;  %v528_v29 = vmul.f32 %v850_v17, %v511_v18  ;;  %v526_v31 = vmul.f32 %v850_v17, %v509_v20  ;;  %v507_v54 = vld [vmem:[%s847_s22 + $0x30] sm:$0xff] }
  0x16   : > { %v512_v23 = vld [vmem:[%s847_s22 + $0x58] sm:$0xff]  ;;  %v510_v25 = vld [vmem:[%s847_s22 + $0x48] sm:$0xff]  ;;  %v521_v36 = vmul.f32 %v850_v17, %v504_v22  ;;  %v519_v42 = vmul.f32 %v850_v17, %v502_v24  ;;  %v515_v55 = vld [vmem:[%s847_s22 + $0x70] sm:$0xff] }
  0x17   : > { %v529_v37 = vmul.f32 %v850_v17, %v512_v23  ;;  %v527_v43 = vmul.f32 %v850_v17, %v510_v25  ;;  %v505_v60 = vld [vmem:[%s847_s22 + $0x20] sm:$0xff]  ;;  %v508_v2 = vld [vmem:[%s847_s22 + $0x38] sm:$0xff] }
  0x18   : > { %689 = vmatpush3.bf16.msra.mxu0 %v740_v6  ;;  %724 = vmatpush3.bf16.msra.mxu1 %v740_v6  ;;  %v513_v61 = vld [vmem:[%s847_s22 + $0x60] sm:$0xff]  ;;  %v516_v3 = vld [vmem:[%s847_s22 + $0x78] sm:$0xff]  ;;  %v524_v6 = vmul.f32 %v850_v17, %v507_v54  ;;  %v525_v22 = vmul.f32 %v850_v17, %v508_v2 }
  0x19   : > { %690 = vmatprep.subr.bf16.mxu0 %v741_v7  ;;  %717 = vmatprep.subr.bf16.mxu1 %v741_v7  ;;  %v533_v23 = vmul.f32 %v850_v17, %v516_v3 }
  0x1c   : > { %691 = vmatpush3.bf16.msra.mxu0 %v741_v7  ;;  %725 = vmatpush3.bf16.msra.mxu1 %v741_v7  ;;  %v532_v7 = vmul.f32 %v850_v17, %v515_v55 }
  0x1d   : > { %692 = vmatprep.subr.bf16.mxu0 %v742_v8  ;;  %718 = vmatprep.subr.bf16.mxu1 %v742_v8 }
  0x20   : > { %693 = vmatpush3.bf16.msra.mxu0 %v742_v8  ;;  %726 = vmatpush3.bf16.msra.mxu1 %v742_v8  ;;  %v506_v8 = vld [vmem:[%s847_s22 + $0x28] sm:$0xff] }
  0x21   : > { %694 = vmatprep.subr.bf16.mxu0 %v743_v9  ;;  %719 = vmatprep.subr.bf16.mxu1 %v743_v9 }
  0x24   : > { %695 = vmatpush3.bf16.msra.mxu0 %v743_v9  ;;  %727 = vmatpush3.bf16.msra.mxu1 %v743_v9  ;;  %v514_v9 = vld [vmem:[%s847_s22 + $0x68] sm:$0xff] }
  0x27   : > { %697 = vmatmul.mubr.bf16.vlgmr.msra.gmra.mrb[0].mxu0 %v746_v10  ;;  %705 = vmatmul.mubr.bf16.vlgmr.msra.gmra.mrb[0].mxu1 %v747_v11 }
  0x28   : > { %700 = vmatprep.mubr.bf16.mxu0 %v748_v12  ;;  %708 = vmatprep.mubr.bf16.mxu1 %v749_v13 }
  0x2f   : > { %701 = vmatmul.mubr.bf16.gmra.mrb[4].mxu0 %v750_v14  ;;  %709 = vmatmul.mubr.bf16.gmra.mrb[4].mxu1 %v751_v15  ;;  %v522_v14 = vmul.f32 %v850_v17, %v505_v60  ;;  %v530_v15 = vmul.f32 %v850_v17, %v513_v61 }
  0xfa   : > { %v698_v26 = vpop.f32.mrb[0].mxu0  ;;  %v706_v28 = vpop.f32.mrb[0].mxu1 }
  0xfb   : > { %v430_v32 = vadd.f32 %v698_v26, %v858_v21  ;;  %v462_v33 = vadd.f32 %v706_v28, %v858_v21  ;;  %v421_v34 = vpop.f32.mrb[1].mxu0  ;;  %v453_v35 = vpop.f32.mrb[1].mxu1  ;;  %v523_v28 = vmul.f32 %v850_v17, %v506_v8 }
  0xfc   : > { %v422_v38 = vadd.f32 %v858_v21, %v421_v34  ;;  %v454_v39 = vadd.f32 %v858_v21, %v453_v35  ;;  %v699_v40 = vpop.f32.mrb[2].mxu0  ;;  %v707_v41 = vpop.f32.mrb[2].mxu1 }
  0xfd   : > { %v486_v44 = vmax.f32 %v430_v32, 0.0  ;;  %v494_v45 = vmax.f32 %v462_v33, 0.0  ;;  %v433_v46 = vadd.f32 %v699_v40, %v858_v21  ;;  %v465_v47 = vadd.f32 %v707_v41, %v858_v21  ;;  %v424_v48 = vpop.f32.mrb[3].mxu0  ;;  %v456_v49 = vpop.f32.mrb[3].mxu1 }
  0xfe   : > { %v484_v50 = vmax.f32 %v422_v38, 0.0  ;;  %v492_v51 = vmax.f32 %v454_v39, 0.0  ;;  %v425_v52 = vadd.f32 %v858_v21, %v424_v48  ;;  %v457_v53 = vadd.f32 %v858_v21, %v456_v49 }
  0xff   : > { %v536_v56 = vadd.f32 %v520_v27, %v486_v44  ;;  %v544_v57 = vadd.f32 %v528_v29, %v494_v45  ;;  %v487_v58 = vmax.f32 %v433_v46, 0.0  ;;  %v495_v59 = vmax.f32 %v465_v47, 0.0 }
 0x100   : > { %v534_v62 = vadd.f32 %v518_v30, %v484_v50  ;;  %v542_v63 = vadd.f32 %v526_v31, %v492_v51  ;;  %v485_v0 = vmax.f32 %v425_v52, 0.0  ;;  %v493_v1 = vmax.f32 %v457_v53, 0.0 }
 0x101   : > { %552 = vst [vmem:[%s883_s27 + $0x10] sm:$0xff] %v536_v56  ;;  %560 = vst [vmem:[%s883_s27 + $0x50] sm:$0xff] %v544_v57  ;;  %v537_v4 = vadd.f32 %v521_v36, %v487_v58  ;;  %v545_v5 = vadd.f32 %v529_v37, %v495_v59  ;;  %v531_v29 = vmul.f32 %v850_v17, %v514_v9 }
 0x102   : > { %550 = vst [vmem:[%s883_s27] sm:$0xff] %v534_v62  ;;  %558 = vst [vmem:[%s883_s27 + $0x40] sm:$0xff] %v542_v63  ;;  %v535_v10 = vadd.f32 %v519_v42, %v485_v0  ;;  %v543_v11 = vadd.f32 %v527_v43, %v493_v1  ;;  %v702_v12 = vpop.f32.mrb[4].mxu0  ;;  %v710_v13 = vpop.f32.mrb[4].mxu1 }
 0x103   : > { %553 = vst [vmem:[%s883_s27 + $0x18] sm:$0xff] %v537_v4  ;;  %561 = vst [vmem:[%s883_s27 + $0x58] sm:$0xff] %v545_v5  ;;  %v446_v16 = vadd.f32 %v702_v12, %v858_v21  ;;  %v478_v18 = vadd.f32 %v710_v13, %v858_v21  ;;  %v437_v19 = vpop.f32.mrb[5].mxu0  ;;  %v469_v20 = vpop.f32.mrb[5].mxu1 }
 0x104   : > { %551 = vst [vmem:[%s883_s27 + $0x8] sm:$0xff] %v535_v10  ;;  %559 = vst [vmem:[%s883_s27 + $0x48] sm:$0xff] %v543_v11  ;;  %v438_v24 = vadd.f32 %v858_v21, %v437_v19  ;;  %v470_v25 = vadd.f32 %v858_v21, %v469_v20  ;;  %v703_v26 = vpop.f32.mrb[6].mxu0  ;;  %v711_v27 = vpop.f32.mrb[6].mxu1 }
 0x105   : > { %v490_v30 = vmax.f32 %v446_v16, 0.0  ;;  %v498_v31 = vmax.f32 %v478_v18, 0.0  ;;  %v449_v32 = vadd.f32 %v703_v26, %v858_v21  ;;  %v481_v33 = vadd.f32 %v711_v27, %v858_v21  ;;  %v440_v34 = vpop.f32.mrb[7].mxu0  ;;  %v472_v35 = vpop.f32.mrb[7].mxu1 }
 0x106   : > { %v488_v36 = vmax.f32 %v438_v24, 0.0  ;;  %v496_v37 = vmax.f32 %v470_v25, 0.0  ;;  %v441_v38 = vadd.f32 %v858_v21, %v440_v34  ;;  %v473_v39 = vadd.f32 %v858_v21, %v472_v35 }
 0x107   : > { %v540_v40 = vadd.f32 %v524_v6, %v490_v30  ;;  %v548_v17 = vadd.f32 %v532_v7, %v498_v31  ;;  %v491_v41 = vmax.f32 %v449_v32, 0.0  ;;  %v499_v42 = vmax.f32 %v481_v33, 0.0 }
 0x108   : > { %v538_v43 = vadd.f32 %v522_v14, %v488_v36  ;;  %v546_v44 = vadd.f32 %v530_v15, %v496_v37  ;;  %v489_v45 = vmax.f32 %v441_v38, 0.0  ;;  %v497_v46 = vmax.f32 %v473_v39, 0.0 }
 0x109   : > { %556 = vst [vmem:[%s883_s27 + $0x30] sm:$0xff] %v540_v40  ;;  %564 = vst [vmem:[%s883_s27 + $0x70] sm:$0xff] %v548_v17  ;;  %v541_v47 = vadd.f32 %v525_v22, %v491_v41  ;;  %v549_v48 = vadd.f32 %v533_v23, %v499_v42 }
 0x10a   : > { %554 = vst [vmem:[%s883_s27 + $0x20] sm:$0xff] %v538_v43  ;;  %562 = vst [vmem:[%s883_s27 + $0x60] sm:$0xff] %v546_v44  ;;  %v539_v49 = vadd.f32 %v523_v28, %v489_v45  ;;  %v547_v21 = vadd.f32 %v531_v29, %v497_v46 }
 0x10b   : > { %557 = vst [vmem:[%s883_s27 + $0x38] sm:$0xff] %v541_v47  ;;  %565 = vst [vmem:[%s883_s27 + $0x78] sm:$0xff] %v549_v48 }
 0x10c   : > { %555 = vst [vmem:[%s883_s27 + $0x28] sm:$0xff] %v539_v49  ;;  %563 = vst [vmem:[%s883_s27 + $0x68] sm:$0xff] %v547_v21 }
 0x10d PF: > { %s16_s20 = sadd.s32 1, %s758_s20  }
 0x10e   : > { %p13_p4 = scmp.ge.s32.totalorder %s16_s20, 6  }
 0x110   :  { %15 = sbr.rel (!%p13_p4) target bundleno = 2 (0x2), region = 73 }

</bundles_post_ra>
